<compile_context>
chip_gen: v7x
topology: tpu7x:2x2x1
jax: 0.10.0
libtpu: 0.0.40
codegen_flags: <defaults>
</compile_context>

<pallas_src>
import functools

import jax
import jax.numpy as jnp
from jax.experimental import pallas as pl
from jax.experimental.pallas import tpu as pltpu


def _round_up(v: int, m: int) -> int:
    return ((v + m - 1) // m) * m


def _linear_kernel(x_ref, wt_ref, b_ref, o_ref):
    # x_ref: (TB, Dp), wt_ref: (Dp, Op), b_ref: (1, Op) f32, o_ref: (TB, Op)
    acc = jnp.dot(
        x_ref[...],
        wt_ref[...],
        preferred_element_type=jnp.float32,
        precision=jax.lax.Precision.HIGHEST,
    )
    # Single one-shot store with the bias add fused (keeps the lone vst slot
    # happy on v5e); bias add is done in f32.
    o_ref[...] = (acc + b_ref[...]).astype(o_ref.dtype)


def _pick_batch_tile(b: int, d_pad: int, o_pad: int, itemsize: int) -> int:
    """Largest batch tile (multiple of 8, <=2048) under a conservative VMEM budget."""
    # 12 MiB budget sits below even v5e's 16 MiB scoped-VMEM default.
    vmem_budget = 12 * 1024 * 1024
    # Constant-index_map BlockSpecs still allocate 2 buffers even though the
    # re-DMA is skipped -> count weight + bias double-buffered.
    resident = 2 * (d_pad * o_pad + o_pad) * itemsize
    per_row = 2 * (d_pad + o_pad) * itemsize  # double-buffered x row + out row
    tb = (vmem_budget - resident) // max(per_row, 1)
    tb = min(2048, (tb // 8) * 8)
    tb = max(8, tb)
    if b <= tb:
        return b  # single full-extent block (allowed even if b % 8 != 0)
    return tb


@functools.partial(jax.jit, static_argnames=("return_padded",))
def meta_head_forward(x, weight, bias, *, return_padded=False):
    """Forward pass of MetaHead: linear(x) with weight (O, D), bias (O,)."""
    B, D = x.shape
    O = weight.shape[0]
    dtype = x.dtype
    itemsize = jnp.dtype(dtype).itemsize

    # Only pad D when needed (D=256 in the reference config -> no pad, no extra
    # HBM pass over x).
    D_pad = _round_up(D, 128)
    O_pad = _round_up(max(O, 128), 128)  # exactly 128 for O=5: lane-dense output

    TB = _pick_batch_tile(B, D_pad, O_pad, itemsize)
    # v7x has 2 TensorCores: make sure there are >=2 grid steps when there is
    # enough work so the "parallel" batch axis can be sharded across cores.
    if B >= 16 and pl.cdiv(B, TB) == 1:
        TB = _round_up((B + 1) // 2, 8)
    grid = (pl.cdiv(B, TB),)

    # x is fed directly (no batch pad); partial last block is masked by Pallas.
    x_in = x if D_pad == D else jnp.pad(x, ((0, 0), (0, D_pad - D)))
    # One-time tiny layout prep for the weight/bias (zero padding is exact:
    # padded K rows contribute 0, padded N columns are sliced off below).
    w_t = jnp.pad(weight.T.astype(dtype), ((0, D_pad - D), (0, O_pad - O)))
    b_2 = jnp.pad(bias.astype(jnp.float32).reshape(1, O), ((0, 0), (0, O_pad - O)))

    cost = pl.CostEstimate(
        flops=2 * B * D_pad * O_pad,
        transcendentals=0,
        bytes_accessed=(B * D_pad + D_pad * O_pad + O_pad + B * O_pad) * itemsize,
    )

    out = pl.pallas_call(
        _linear_kernel,
        out_shape=jax.ShapeDtypeStruct((B, O_pad), dtype),
        grid=grid,
        in_specs=[
            pl.BlockSpec((TB, D_pad), lambda i: (i, 0)),     # x tiles stream in
            pl.BlockSpec((D_pad, O_pad), lambda i: (0, 0)),  # W^T stays VMEM-resident
            pl.BlockSpec((1, O_pad), lambda i: (0, 0)),      # bias stays VMEM-resident
        ],
        out_specs=pl.BlockSpec((TB, O_pad), lambda i: (i, 0)),
        compiler_params=pltpu.CompilerParams(
            dimension_semantics=(pltpu.PARALLEL,),  # megacore-shard batch tiles
        ),
        cost_estimate=cost,
    )(x_in, w_t, b_2)

    if return_padded:
        # Hand the lane-dense (B, 128) buffer to the consumer; columns >= O are 0.
        return out
    # Materializing (B, O) costs one small extra XLA copy (B*128 read, B*O write).
    return out[:, :O]


def init_meta_head_params(key, input_dim=256, output_dim=5, dtype=jnp.float32):
    """Deterministic init mirroring MetaHead._initialize_weights():
       kaiming_normal_(weight) -> N(0, sqrt(2/fan_in)), bias = 0."""
    std = (2.0 / input_dim) ** 0.5
    weight = std * jax.random.normal(key, (output_dim, input_dim), dtype=dtype)
    bias = jnp.zeros((output_dim,), dtype=dtype)
    return weight, bias


# TODO(synk): clone()/adapt() are training-time meta-learning utilities (state
# copy + manual SGD on autograd grads); they are not part of the forward pass
# and have no kernel equivalent here.

if __name__ == "__main__":
    key = jax.random.PRNGKey(0)
    k_w, k_x = jax.random.split(key)

    input_dim = 256
    output_dim = 5
    batch = 8

    weight, bias = init_meta_head_params(k_w, input_dim, output_dim)
    x = jax.random.normal(k_x, (batch, input_dim), dtype=jnp.float32)

    out = meta_head_forward(x, weight, bias)
    out = jax.block_until_ready(out)

    # Cross-check against a plain JAX reference (HIGHEST precision on both
    # sides for exact-f32 parity with PyTorch fp32 nn.Linear).
    ref = jnp.dot(x, weight.T, precision=jax.lax.Precision.HIGHEST) + bias
    assert out.shape == (batch, output_dim)
    assert jnp.allclose(out, ref, atol=1e-5, rtol=1e-5)

    print("KERNEL_OK")
</pallas_src>

<mosaic_0001>
module attributes {stable_mosaic.version = 11 : i64} {
  func.func @_linear_kernel(%arg0: i32, %arg1: memref<8x256xf32, #tpu.memory_space<vmem>>, %arg2: memref<256x128xf32, #tpu.memory_space<vmem>>, %arg3: memref<1x128xf32, #tpu.memory_space<vmem>>, %arg4: memref<8x128xf32, #tpu.memory_space<vmem>>) attributes {dimension_semantics = [#tpu.dimension_semantics<parallel>], iteration_bounds = array<i64: 1>, scalar_prefetch = 0 : i64, scratch_operands = 0 : i64, tpu.core_type = #tpu.core_type<tc>, window_params = [{transform_indices = @transform_0, window_bounds = array<i64: 8, 256>}, {pipeline_mode = #tpu.pipeline_mode<synchronous>, transform_indices = @transform_1, window_bounds = array<i64: 256, 128>}, {pipeline_mode = #tpu.pipeline_mode<synchronous>, transform_indices = @transform_2, window_bounds = array<i64: 1, 128>}, {transform_indices = @transform_3, window_bounds = array<i64: 8, 128>}]} {
    %c0 = arith.constant 0 : index
    %c0_0 = arith.constant 0 : index
    %0 = vector.load %arg1[%c0, %c0_0] : memref<8x256xf32, #tpu.memory_space<vmem>>, vector<8x256xf32>
    %c0_1 = arith.constant 0 : index
    %c0_2 = arith.constant 0 : index
    %1 = vector.load %arg2[%c0_1, %c0_2] : memref<256x128xf32, #tpu.memory_space<vmem>>, vector<256x128xf32>
    %cst = arith.constant dense<0.000000e+00> : vector<8x128xf32>
    %2 = tpu.matmul %0, %1, %cst {dimension_numbers = #tpu.dot_dimension_numbers<[1], [0], [0], [1], [0, 0, 1, 1], [], []>, precision = #tpu.contract_precision<fp32>} : vector<8x256xf32>, vector<256x128xf32>, vector<8x128xf32> -> vector<8x128xf32>
    %c0_3 = arith.constant 0 : index
    %c0_4 = arith.constant 0 : index
    %3 = vector.load %arg3[%c0_3, %c0_4] : memref<1x128xf32, #tpu.memory_space<vmem>>, vector<1x128xf32>
    %4 = vector.broadcast %3 : vector<1x128xf32> to vector<8x128xf32>
    %5 = arith.addf %2, %4 : vector<8x128xf32>
    %c0_5 = arith.constant 0 : index
    %c0_6 = arith.constant 0 : index
    %6 = vector.load %arg4[%c0_5, %c0_6] : memref<8x128xf32, #tpu.memory_space<vmem>>, vector<8x128xf32>
    tpu.vector_store %arg4[%c0_5, %c0_6], %5 {strides = array<i32>} : memref<8x128xf32, #tpu.memory_space<vmem>>, vector<8x128xf32>,
    return
  }
  func.func @transform_0(%arg0: i32) -> (i32, i32) {
    %c0_i32 = arith.constant 0 : i32
    %c0_i32_0 = arith.constant 0 : i32
    return %arg0, %c0_i32 : i32, i32
  }
  func.func @transform_1(%arg0: i32) -> (i32, i32) {
    %c0_i32 = arith.constant 0 : i32
    %c0_i32_0 = arith.constant 0 : i32
    %c0_i32_1 = arith.constant 0 : i32
    return %c0_i32, %c0_i32_0 : i32, i32
  }
  func.func @transform_2(%arg0: i32) -> (i32, i32) {
    %c0_i32 = arith.constant 0 : i32
    %c0_i32_0 = arith.constant 0 : i32
    %c0_i32_1 = arith.constant 0 : i32
    return %c0_i32, %c0_i32_0 : i32, i32
  }
  func.func @transform_3(%arg0: i32) -> (i32, i32) {
    %c0_i32 = arith.constant 0 : i32
    %c0_i32_0 = arith.constant 0 : i32
    return %arg0, %c0_i32 : i32, i32
  }
}

</mosaic_0001>

<bundles_post_ra>
// kernel: meta_head_forward.1
= control target key start
LH: loop header
LB: loop body
LE: loop exit
PB: predicated region body
PF: predicated region fallthrough
CT: control target
= control target key end

     0   :  { %s1897_s0 = inlined_call_operand.vmem [shape: f32[8,256], index: 0, kind: input, shape index: {}]   ;;  %s1898_s1 = inlined_call_operand.vmem [shape: f32[256,128], index: 1, kind: input, shape index: {}]   ;;  %s1899_s2 = inlined_call_operand.vmem [shape: f32[1,128], index: 2, kind: input, shape index: {}]   ;;  %s1900_s3 = inlined_call_operand.hbm [shape: f32[8,128], index: 3, kind: output, shape index: {}]  }
   0x1   :  { %v33_v0 = vld [vmem:[%s1898_s1 + $0x80] sm:$0xff]  ;;  %v34_v1 = vld [vmem:[%s1898_s1 + $0x88] sm:$0xff]  ;;  %v35_v7 = vld [vmem:[%s1898_s1 + $0x90] sm:$0xff] }
   0x2   :  { %v17_v2 = vld [vmem:[%s1898_s1] sm:$0xff]  ;;  %v105_v3 = vand.u32 4294901760, %v33_v0  ;;  %v108_v4 = vand.u32 4294901760, %v34_v1  ;;  %v18_v5 = vld [vmem:[%s1898_s1 + $0x8] sm:$0xff]  ;;  %v36_v8 = vld [vmem:[%s1898_s1 + $0x98] sm:$0xff]  ;;  %v111_v10 = vand.u32 4294901760, %v35_v7 }
   0x3   :  { %v57_v6 = vand.u32 4294901760, %v17_v2  ;;  %v60_v9 = vand.u32 4294901760, %v18_v5  ;;  %v114_v11 = vand.u32 4294901760, %v36_v8  ;;  %v19_v12 = vld [vmem:[%s1898_s1 + $0x10] sm:$0xff]  ;;  %v20_v13 = vld [vmem:[%s1898_s1 + $0x18] sm:$0xff]  ;;  %v37_v18 = vld [vmem:[%s1898_s1 + $0xa0] sm:$0xff] }
   0x4   :  { %v1406_v14 = vpack.c.bf16 %v108_v4, %v105_v3  ;;  %v63_v16 = vand.u32 4294901760, %v19_v12  ;;  %v66_v17 = vand.u32 4294901760, %v20_v13  ;;  %v38_v19 = vld [vmem:[%s1898_s1 + $0xa8] sm:$0xff]  ;;  %v21_v23 = vld [vmem:[%s1898_s1 + $0x20] sm:$0xff]  ;;  %v1429_v25 = vsub.f32 %v35_v7, %v111_v10  ;;  %v39_v37 = vld [vmem:[%s1898_s1 + $0xb0] sm:$0xff] }
   0x5   :  { %v1408_v15 = vsub.f32 %v17_v2, %v57_v6  ;;  %v1416_v20 = vpack.c.bf16 %v60_v9, %v57_v6  ;;  %v1418_v21 = vsub.f32 %v18_v5, %v60_v9  ;;  %v1420_v22 = vpack.c.bf16 %v114_v11, %v111_v10  ;;  %v22_v24 = vld [vmem:[%s1898_s1 + $0x28] sm:$0xff]  ;;  %v40_v42 = vld [vmem:[%s1898_s1 + $0xb8] sm:$0xff]  ;;  %v23_v55 = vld [vmem:[%s1898_s1 + $0x30] sm:$0xff] }
   0x6   :  { %1145 = vmatprep.subr.bf16.mxu0 %v1406_v14  ;;  %v1431_v26 = vsub.f32 %v36_v8, %v114_v11  ;;  %v1433_v27 = vpack.c.bf16 %v66_v17, %v63_v16  ;;  %v1435_v28 = vsub.f32 %v19_v12, %v63_v16  ;;  %v117_v29 = vand.u32 4294901760, %v37_v18  ;;  %v24_v56 = vld [vmem:[%s1898_s1 + $0x38] sm:$0xff] }
   0x7   :  { %1147 = vmatpush3.bf16.msra.mxu0 %v1416_v20  ;;  %v120_v30 = vand.u32 4294901760, %v38_v19  ;;  %v1438_v31 = vsub.f32 %v33_v0, %v105_v3  ;;  %v1440_v32 = vsub.f32 %v34_v1, %v108_v4  ;;  %v69_v33 = vand.u32 4294901760, %v21_v23 }
   0x8   :  { %1149 = vmatprep.subr.bf16.mxu0 %v1420_v22  ;;  %v72_v34 = vand.u32 4294901760, %v22_v24  ;;  %v1917_v35 = vand.u32 4294901760, %v1408_v15  ;;  %v1916_v36 = vand.u32 4294901760, %v1418_v21  ;;  %v1448_v38 = vsub.f32 %v20_v13, %v66_v17 }
   0x9   :  { %v1450_v39 = vpack.c.bf16 %v120_v30, %v117_v29  ;;  %v1452_v40 = vsub.f32 %v37_v18, %v117_v29  ;;  %v1922_v41 = vand.u32 4294901760, %v1438_v31  ;;  %v1458_v43 = vsub.f32 %v38_v19, %v120_v30 }
   0xa   :  { %v1919_v44 = vand.u32 4294901760, %v1440_v32  ;;  %v1461_v45 = vpack.c.bf16 %v72_v34, %v69_v33  ;;  %v1463_v46 = vsub.f32 %v21_v23, %v69_v33  ;;  %v172_v48 = vsub.f32 %v1408_v15, %v1917_v35 }
   0xb   :  { %1151 = vmatpush3.bf16.msra.mxu0 %v1433_v27  ;;  %v284_v47 = vsub.f32 %v1438_v31, %v1922_v41  ;;  %v179_v49 = vsub.f32 %v1418_v21, %v1916_v36  ;;  %v123_v50 = vand.u32 4294901760, %v39_v37  ;;  %v126_v52 = vand.u32 4294901760, %v40_v42 }
   0xc   :  { %1153 = vmatprep.subr.bf16.mxu0 %v1450_v39  ;;  %v291_v51 = vsub.f32 %v1440_v32, %v1919_v44  ;;  %v1914_v53 = vand.u32 4294901760, %v1429_v25  ;;  %v1913_v54 = vand.u32 4294901760, %v1431_v26  ;;  %v1487_v58 = vsub.f32 %v22_v24, %v72_v34 }
   0xd   :  { %v285_v57 = vand.u32 4294901760, %v284_v47  ;;  %v173_v59 = vand.u32 4294901760, %v172_v48  ;;  %v180_v60 = vand.u32 4294901760, %v179_v49 }
   0xe   :  { %8 = vsyncpa [#allocation3], 0  ;;  %v292_v61 = vand.u32 4294901760, %v291_v51  ;;  %v1489_v62 = vpack.c.bf16 %v126_v52, %v123_v50  ;;  %v1491_v63 = vsub.f32 %v39_v37, %v123_v50  ;;  %v298_v0 = vsub.f32 %v1429_v25, %v1914_v53  ;;  %v41_v5 = vld [vmem:[%s1898_s1 + $0xc0] sm:$0xff]  ;;  %v42_v6 = vld [vmem:[%s1898_s1 + $0xc8] sm:$0xff] }
   0xf   :  { %1155 = vmatpush3.bf16.msra.mxu0 %v1461_v45  ;;  %v1178_v1 = vpack.c.bf16 %v180_v60, %v173_v59  ;;  %v305_v2 = vsub.f32 %v1431_v26, %v1913_v54  ;;  %v75_v3 = vand.u32 4294901760, %v23_v55  ;;  %v78_v4 = vand.u32 4294901760, %v24_v56  ;;  %v25_v11 = vld [vmem:[%s1898_s1 + $0x40] sm:$0xff]  ;;  %v26_v29 = vld [vmem:[%s1898_s1 + $0x48] sm:$0xff] }
  0x10   :  { %v1176_v7 = vpack.c.bf16 %v292_v61, %v285_v57  ;;  %1157 = vmatprep.subr.bf16.mxu0 %v1489_v62  ;;  %v299_v8 = vand.u32 4294901760, %v298_v0  ;;  %v1912_v9 = vand.u32 4294901760, %v1435_v28  ;;  %v1909_v10 = vand.u32 4294901760, %v1448_v38  ;;  %v44_v57 = vld [vmem:[%s1898_s1 + $0xd8] sm:$0xff] }
  0x11   :  { %v1512_v12 = vsub.f32 %v40_v42, %v126_v52  ;;  %v306_v13 = vand.u32 4294901760, %v305_v2  ;;  %v1514_v16 = vpack.c.bf16 %v78_v4, %v75_v3  ;;  %v1516_v17 = vsub.f32 %v23_v55, %v75_v3 }
  0x12   :  { %1177 = vmatprep.subr.bf16.mxu1 %v1176_v7  ;;  %v186_v18 = vsub.f32 %v1435_v28, %v1912_v9  ;;  %v193_v19 = vsub.f32 %v1448_v38, %v1909_v10  ;;  %v129_v23 = vand.u32 4294901760, %v41_v5  ;;  %v132_v24 = vand.u32 4294901760, %v42_v6 }
  0x13   :  { %1179 = vmatpush3.bf16.msra.mxu1 %v1178_v1  ;;  %v1180_v30 = vpack.c.bf16 %v306_v13, %v299_v8  ;;  %1159 = vmatpush3.bf16.msra.mxu0 %v1514_v16  ;;  %v1907_v33 = vand.u32 4294901760, %v1452_v40  ;;  %v1906_v34 = vand.u32 4294901760, %v1458_v43  ;;  %v81_v37 = vand.u32 4294901760, %v25_v11  ;;  %v27_v1 = vld [vmem:[%s1898_s1 + $0x50] sm:$0xff] }
  0x14   :  { %v1530_v42 = vsub.f32 %v24_v56, %v78_v4  ;;  %v187_v47 = vand.u32 4294901760, %v186_v18  ;;  %v194_v48 = vand.u32 4294901760, %v193_v19  ;;  %v1532_v49 = vpack.c.bf16 %v132_v24, %v129_v23  ;;  %v43_v56 = vld [vmem:[%s1898_s1 + $0xd0] sm:$0xff]  ;;  %v28_v18 = vld [vmem:[%s1898_s1 + $0x58] sm:$0xff] }
  0x15   :  { %1181 = vmatprep.subr.bf16.mxu1 %v1180_v30  ;;  %v1534_v50 = vsub.f32 %v41_v5, %v129_v23  ;;  %v312_v51 = vsub.f32 %v1452_v40, %v1907_v33  ;;  %v319_v52 = vsub.f32 %v1458_v43, %v1906_v34  ;;  %v84_v55 = vand.u32 4294901760, %v26_v29 }
  0x16   :  { %v1182_v59 = vpack.c.bf16 %v194_v48, %v187_v47  ;;  %1161 = vmatprep.subr.bf16.mxu0 %v1532_v49  ;;  %v1549_v60 = vsub.f32 %v42_v6, %v132_v24  ;;  %v1904_v61 = vand.u32 4294901760, %v1463_v46  ;;  %v1903_v0 = vand.u32 4294901760, %v1487_v58 }
  0x17   :  { %v313_v2 = vand.u32 4294901760, %v312_v51  ;;  %v320_v3 = vand.u32 4294901760, %v319_v52  ;;  %v1556_v4 = vpack.c.bf16 %v84_v55, %v81_v37  ;;  %v1558_v5 = vsub.f32 %v25_v11, %v81_v37 }
  0x18   :  { %1183 = vmatpush3.bf16.msra.mxu1 %v1182_v59  ;;  %v200_v6 = vsub.f32 %v1463_v46, %v1904_v61  ;;  %v207_v7 = vsub.f32 %v1487_v58, %v1903_v0  ;;  %v135_v8 = vand.u32 4294901760, %v43_v56  ;;  %v138_v13 = vand.u32 4294901760, %v44_v57 }
  0x19   :  { %v1184_v19 = vpack.c.bf16 %v320_v3, %v313_v2  ;;  %1163 = vmatpush3.bf16.msra.mxu0 %v1556_v4  ;;  %v1902_v11 = vand.u32 4294901760, %v1491_v63  ;;  %v1901_v23 = vand.u32 4294901760, %v1512_v12  ;;  %v87_v24 = vand.u32 4294901760, %v27_v1 }
  0x1a   :  { %v1572_v30 = vsub.f32 %v26_v29, %v84_v55  ;;  %v201_v37 = vand.u32 4294901760, %v200_v6  ;;  %v208_v47 = vand.u32 4294901760, %v207_v7  ;;  %v1574_v48 = vpack.c.bf16 %v138_v13, %v135_v8  ;;  %v45_v29 = vld [vmem:[%s1898_s1 + $0xe0] sm:$0xff]  ;;  %v46_v55 = vld [vmem:[%s1898_s1 + $0xe8] sm:$0xff] }
  0x1b   :  { %1185 = vmatprep.subr.bf16.mxu1 %v1184_v19  ;;  %v1576_v51 = vsub.f32 %v43_v56, %v135_v8  ;;  %v326_v52 = vsub.f32 %v1491_v63, %v1902_v11  ;;  %v333_v59 = vsub.f32 %v1512_v12, %v1901_v23  ;;  %v90_v2 = vand.u32 4294901760, %v28_v18  ;;  %v29_v8 = vld [vmem:[%s1898_s1 + $0x60] sm:$0xff] }
  0x1c   :  { %v1186_v3 = vpack.c.bf16 %v208_v47, %v201_v37  ;;  %1165 = vmatprep.subr.bf16.mxu0 %v1574_v48  ;;  %v1591_v56 = vsub.f32 %v44_v57, %v138_v13  ;;  %v1905_v6 = vand.u32 4294901760, %v1516_v17  ;;  %v1908_v7 = vand.u32 4294901760, %v1530_v42 }
  0x1d   :  { %v327_v19 = vand.u32 4294901760, %v326_v52  ;;  %v334_v23 = vand.u32 4294901760, %v333_v59  ;;  %v1598_v11 = vpack.c.bf16 %v90_v2, %v87_v24  ;;  %v1600_v0 = vsub.f32 %v27_v1, %v87_v24  ;;  %v30_v52 = vld [vmem:[%s1898_s1 + $0x68] sm:$0xff] }
  0x1e   :  { %1187 = vmatpush3.bf16.msra.mxu1 %v1186_v3  ;;  %v214_v57 = vsub.f32 %v1516_v17, %v1905_v6  ;;  %v221_v13 = vsub.f32 %v1530_v42, %v1908_v7  ;;  %v141_v37 = vand.u32 4294901760, %v45_v29  ;;  %v144_v47 = vand.u32 4294901760, %v46_v55 }
  0x1f   :  { %1946 = vst [vmem:[#allocation5_spill] sm:$0xff] %v1598_v11  ;;  %v1188_v59 = vpack.c.bf16 %v334_v23, %v327_v19  ;;  %1167 = vmatpush3.bf16.msra.mxu0 %v1598_v11  ;;  %v1911_v1 = vand.u32 4294901760, %v1534_v50  ;;  %v1910_v24 = vand.u32 4294901760, %v1549_v60  ;;  %v93_v3 = vand.u32 4294901760, %v29_v8 }
  0x20   :  { %v1614_v61 = vsub.f32 %v28_v18, %v90_v2  ;;  %v215_v6 = vand.u32 4294901760, %v214_v57  ;;  %v222_v34 = vand.u32 4294901760, %v221_v13  ;;  %v1616_v33 = vpack.c.bf16 %v144_v47, %v141_v37  ;;  %v47_v18 = vld [vmem:[%s1898_s1 + $0xf0] sm:$0xff]  ;;  %v48_v2 = vld [vmem:[%s1898_s1 + $0xf8] sm:$0xff] }
  0x21   :  { %1189 = vmatprep.subr.bf16.mxu1 %v1188_v59  ;;  %v1618_v7 = vsub.f32 %v45_v29, %v141_v37  ;;  %v340_v23 = vsub.f32 %v1534_v50, %v1911_v1  ;;  %v347_v19 = vsub.f32 %v1549_v60, %v1910_v24  ;;  %v96_v10 = vand.u32 4294901760, %v30_v52  ;;  %v31_v59 = vld [vmem:[%s1898_s1 + $0x70] sm:$0xff] }
  0x22   :  { %1947 = vst [vmem:[#allocation6_spill] sm:$0xff] %v1616_v33  ;;  %v1190_v57 = vpack.c.bf16 %v222_v34, %v215_v6  ;;  %1169 = vmatprep.subr.bf16.mxu0 %v1616_v33  ;;  %v1633_v29 = vsub.f32 %v46_v55, %v144_v47  ;;  %v1915_v13 = vand.u32 4294901760, %v1558_v5  ;;  %v1918_v37 = vand.u32 4294901760, %v1572_v30 }
  0x23   :  { %v341_v24 = vand.u32 4294901760, %v340_v23  ;;  %v348_v1 = vand.u32 4294901760, %v347_v19  ;;  %v1640_v9 = vpack.c.bf16 %v96_v10, %v93_v3  ;;  %v1642_v54 = vsub.f32 %v29_v8, %v93_v3  ;;  %v32_v23 = vld [vmem:[%s1898_s1 + $0x78] sm:$0xff] }
  0x24   :  { %1191 = vmatpush3.bf16.msra.mxu1 %v1190_v57  ;;  %v228_v34 = vsub.f32 %v1558_v5, %v1915_v13  ;;  %v235_v55 = vsub.f32 %v1572_v30, %v1918_v37  ;;  %v147_v6 = vand.u32 4294901760, %v47_v18  ;;  %v150_v47 = vand.u32 4294901760, %v48_v2 }
  0x25   :  { %1948 = vst [vmem:[#allocation7_spill] sm:$0xff] %v1640_v9  ;;  %v1192_v19 = vpack.c.bf16 %v348_v1, %v341_v24  ;;  %1171 = vmatpush3.bf16.msra.mxu0 %v1640_v9  ;;  %v1921_v8 = vand.u32 4294901760, %v1576_v51  ;;  %v1920_v3 = vand.u32 4294901760, %v1591_v56  ;;  %v99_v57 = vand.u32 4294901760, %v31_v59 }
  0x26   :  { %v1656_v53 = vsub.f32 %v30_v52, %v96_v10  ;;  %v229_v13 = vand.u32 4294901760, %v228_v34  ;;  %v236_v36 = vand.u32 4294901760, %v235_v55  ;;  %v1658_v35 = vpack.c.bf16 %v150_v47, %v147_v6  ;;  %v16_v10 = vld [vmem:[%s1897_s0 + $0x8] sm:$0xff] }
  0x27   :  { %1193 = vmatprep.subr.bf16.mxu1 %v1192_v19  ;;  %v1660_v37 = vsub.f32 %v47_v18, %v147_v6  ;;  %v354_v1 = vsub.f32 %v1576_v51, %v1921_v8  ;;  %v361_v24 = vsub.f32 %v1591_v56, %v1920_v3  ;;  %v102_v44 = vand.u32 4294901760, %v32_v23  ;;  %v15_v6 = vld [vmem:[%s1897_s0] sm:$0xff] }
  0x28   :  { %1949 = vst [vmem:[#allocation8_spill] sm:$0xff] %v1658_v35  ;;  %v1194_v52 = vpack.c.bf16 %v236_v36, %v229_v13  ;;  %1173 = vmatprep.subr.bf16.mxu0 %v1658_v35  ;;  %v1672_v34 = vsub.f32 %v48_v2, %v150_v47  ;;  %v1925_v18 = vand.u32 4294901760, %v1600_v0  ;;  %v1926_v55 = vand.u32 4294901760, %v1614_v61 }
  0x29   :  { %v355_v19 = vand.u32 4294901760, %v354_v1  ;;  %v362_v3 = vand.u32 4294901760, %v361_v24  ;;  %v1679_v8 = vpack.c.bf16 %v102_v44, %v99_v57  ;;  %v1681_v41 = vsub.f32 %v31_v59, %v99_v57 }
  0x2a   :  { %1195 = vmatpush3.bf16.msra.mxu1 %v1194_v52  ;;  %v242_v36 = vsub.f32 %v1600_v0, %v1925_v18  ;;  %v249_v2 = vsub.f32 %v1614_v61, %v1926_v55  ;;  %v1689_v13 = vand.u32 4294901760, %v16_v10  ;;  %v1929_v47 = vand.u32 4294901760, %v1618_v7 }
  0x2b   :  { %1950 = vst [vmem:[#allocation9_spill] sm:$0xff] %v1679_v8  ;;  %v1196_v35 = vpack.c.bf16 %v362_v3, %v355_v19  ;;  %1175 = vmatpush3.bf16.msra.mxu0 %v1679_v8  ;;  %v1935_v1 = vand.u32 4294901760, %v1633_v29  ;;  %v1208_v59 = vpack.c.bf16 %v1440_v32, %v1438_v31  ;;  %v1696_v57 = vand.u32 4294901760, %v15_v6 }
  0x2c   :  { %1951 = vst [vmem:[#allocation10_spill] sm:$0xff] %v1689_v13  ;;  %v243_v24 = vand.u32 4294901760, %v242_v36  ;;  %v250_v52 = vand.u32 4294901760, %v249_v2  ;;  %v1699_v18 = vsub.f32 %v16_v10, %v1689_v13  ;;  %v368_v55 = vsub.f32 %v1618_v7, %v1929_v47  ;;  %393 = vmatprep.mubr.f32.mxu1 %v1689_v13 }
  0x2d   :  { %1197 = vmatprep.subr.bf16.mxu1 %v1196_v35  ;;  %v375_v3 = vsub.f32 %v1633_v29, %v1935_v1  ;;  %1209 = vmatprep.subr.bf16.mxu0 %v1208_v59  ;;  %v1709_v19 = vsub.f32 %v15_v6, %v1696_v57  ;;  %v1934_v36 = vand.u32 4294901760, %v1642_v54  ;;  %v1936_v10 = vand.u32 4294901760, %v1656_v53 }
  0x2e   :  { %v1713_v2 = vsub.f32 %v32_v23, %v102_v44  ;;  %v1198_v8 = vpack.c.bf16 %v250_v52, %v243_v24  ;;  %v1937_v47 = vand.u32 4294901760, %v1699_v18  ;;  %v369_v9 = vand.u32 4294901760, %v368_v55 }
  0x2f   :  { %v376_v13 = vand.u32 4294901760, %v375_v3  ;;  %v160_v35 = vand.u32 4294901760, %v1709_v19  ;;  %v256_v59 = vsub.f32 %v1642_v54, %v1934_v36  ;;  %v263_v6 = vsub.f32 %v1656_v53, %v1936_v10 }
  0x30   :  { %1199 = vmatpush3.bf16.msra.mxu1 %v1198_v8  ;;  %v155_v44 = vsub.f32 %v1699_v18, %v1937_v47  ;;  %v1210_v23 = vpack.c.bf16 %v1418_v21, %v1408_v15  ;;  %v1942_v55 = vand.u32 4294901760, %v1660_v37  ;;  %v1945_v24 = vand.u32 4294901760, %v1672_v34 }
  0x31   :  { %v1200_v52 = vpack.c.bf16 %v376_v13, %v369_v9  ;;  %v161_v3 = vsub.f32 %v1709_v19, %v160_v35  ;;  %v257_v36 = vand.u32 4294901760, %v256_v59  ;;  %v264_v1 = vand.u32 4294901760, %v263_v6 }
  0x32   :  { %v156_v10 = vand.u32 4294901760, %v155_v44  ;;  %v382_v8 = vsub.f32 %v1660_v37, %v1942_v55  ;;  %v389_v47 = vsub.f32 %v1672_v34, %v1945_v24  ;;  %v1944_v33 = vand.u32 4294901760, %v1681_v41 }
  0x33   :  { %1201 = vmatprep.subr.bf16.mxu1 %v1200_v52  ;;  %v162_v11 = vand.u32 4294901760, %v161_v3  ;;  %v1202_v9 = vpack.c.bf16 %v264_v1, %v257_v36  ;;  %v1212_v13 = vpack.c.bf16 %v1431_v26, %v1429_v25  ;;  %v1943_v59 = vand.u32 4294901760, %v1713_v2 }
  0x34   :  { %157 = vmatprep.mubr.f32.mxu0 %v156_v10  ;;  %v383_v6 = vand.u32 4294901760, %v382_v8  ;;  %v390_v44 = vand.u32 4294901760, %v389_v47  ;;  %v270_v55 = vsub.f32 %v1681_v41, %v1944_v33  ;;  %v1214_v3 = vpack.c.bf16 %v1448_v38, %v1435_v28 }
  0x35   :  { %163 = vmatmul.mubr.f32.vlgmr.msra.gmra.mrb[0].mxu0 %v162_v11  ;;  %1203 = vmatpush3.bf16.msra.mxu1 %v1202_v9  ;;  %v277_v52 = vsub.f32 %v1713_v2, %v1943_v59  ;;  %v1216_v10 = vpack.c.bf16 %v1458_v43, %v1452_v40  ;;  %v1218_v11 = vpack.c.bf16 %v1487_v58, %v1463_v46  ;;  %v1953_v9 = vand.u32 4294901760, %v1440_v32 }
  0x36   :  { %1211 = vmatpush3.bf16.msra.mxu0 %v1210_v23  ;;  %v1204_v1 = vpack.c.bf16 %v390_v44, %v383_v6  ;;  %v271_v36 = vand.u32 4294901760, %v270_v55  ;;  %530 = vmatprep.mubr.f32.mxu0 %v1699_v18  ;;  %v1220_v8 = vpack.c.bf16 %v1512_v12, %v1491_v63  ;;  %v1952_v55 = vand.u32 4294901760, %v1438_v31 }
  0x37   :  { %1213 = vmatprep.subr.bf16.mxu0 %v1212_v13  ;;  %v278_v47 = vand.u32 4294901760, %v277_v52  ;;  %v1954_v44 = vand.u32 4294901760, %v1408_v15  ;;  %v1955_v13 = vand.u32 4294901760, %v1418_v21  ;;  %v1956_v59 = vand.u32 4294901760, %v1429_v25 }
  0x38   :  { %1205 = vmatprep.subr.bf16.mxu1 %v1204_v1  ;;  %v1272_v6 = vpack.c.bf16 %v1953_v9, %v1952_v55  ;;  %v1957_v1 = vand.u32 4294901760, %v1431_v26  ;;  %v1958_v24 = vand.u32 4294901760, %v1435_v28  ;;  %v1960_v31 = vand.u32 4294901760, %v1452_v40 }
  0x39   :  { %v1206_v23 = vpack.c.bf16 %v278_v47, %v271_v36  ;;  %v1274_v52 = vpack.c.bf16 %v1955_v13, %v1954_v44  ;;  %v1959_v36 = vand.u32 4294901760, %v1448_v38  ;;  %v1961_v32 = vand.u32 4294901760, %v1458_v43  ;;  %v1976_v13 = vld [vmem:[#allocation7_spill] sm:$0xff] }
  0x3a   :  { %v1276_v33 = vpack.c.bf16 %v1957_v1, %v1956_v59  ;;  %1215 = vmatpush3.bf16.msra.mxu0 %v1214_v3  ;;  %v1962_v15 = vand.u32 4294901760, %v1463_v46  ;;  %v1963_v21 = vand.u32 4294901760, %v1487_v58  ;;  %v1964_v25 = vand.u32 4294901760, %v1491_v63  ;;  %v1977_v1 = vld [vmem:[#allocation8_spill] sm:$0xff] }
  0x3b   :  { %v1278_v47 = vpack.c.bf16 %v1959_v36, %v1958_v24  ;;  %v1280_v55 = vpack.c.bf16 %v1961_v32, %v1960_v31  ;;  %v1965_v26 = vand.u32 4294901760, %v1512_v12  ;;  %1207 = vmatpush3.bf16.msra.mxu1 %v1206_v23  ;;  %1217 = vmatprep.subr.bf16.mxu0 %v1216_v10  ;;  %v1966_v28 = vand.u32 4294901760, %v1516_v17  ;;  %v1978_v36 = vld [vmem:[#allocation9_spill] sm:$0xff] }
  0x3c   :  { %v1282_v9 = vpack.c.bf16 %v1963_v21, %v1962_v15  ;;  %v1967_v38 = vand.u32 4294901760, %v1530_v42  ;;  %v1968_v43 = vand.u32 4294901760, %v1534_v50  ;;  %v1969_v24 = vand.u32 4294901760, %v1549_v60  ;;  %1241 = vmatprep.subr.bf16.mxu1 %v1406_v14 }
  0x3d   :  { %v1284_v59 = vpack.c.bf16 %v1965_v26, %v1964_v25  ;;  %v1970_v58 = vand.u32 4294901760, %v1558_v5  ;;  %v1971_v3 = vand.u32 4294901760, %v1572_v30  ;;  %v1222_v12 = vpack.c.bf16 %v1530_v42, %v1516_v17 }
  0x3e   :  { %v1286_v40 = vpack.c.bf16 %v1967_v38, %v1966_v28  ;;  %v1288_v46 = vpack.c.bf16 %v1969_v24, %v1968_v43  ;;  %395 = vmatmul.mubr.f32.vlgmr.msra.gmra.mrb[0].mxu1 %v1696_v57  ;;  %1219 = vmatpush3.bf16.msra.mxu0 %v1218_v11  ;;  %v1224_v10 = vpack.c.bf16 %v1549_v60, %v1534_v50  ;;  %v1972_v23 = vand.u32 4294901760, %v1699_v18  ;;  %v1973_v18 = vld [vmem:[#allocation5_spill] sm:$0xff]  ;;  %v1974_v11 = vld [vmem:[#allocation6_spill] sm:$0xff] }
  0x3f   :  { %v1290_v63 = vpack.c.bf16 %v1971_v3, %v1970_v58  ;;  %1243 = vmatpush3.bf16.msra.mxu1 %v1416_v20  ;;  %1221 = vmatprep.subr.bf16.mxu0 %v1220_v8  ;;  %v1226_v44 = vpack.c.bf16 %v1572_v30, %v1558_v5  ;;  %v1228_v17 = vpack.c.bf16 %v1591_v56, %v1576_v51  ;;  %v1975_v8 = vld [vmem:[#allocation10_spill] sm:$0xff] }
  0x40   :  { %1245 = vmatprep.subr.bf16.mxu1 %v1420_v22  ;;  %637 = vmatprep.mubr.f32.mxu1 %v1972_v23  ;;  %v1230_v42 = vpack.c.bf16 %v1614_v61, %v1600_v0  ;;  %v1232_v50 = vpack.c.bf16 %v1633_v29, %v1618_v7  ;;  %v1234_v60 = vpack.c.bf16 %v1656_v53, %v1642_v54 }
  0x41   :  { %v1236_v5 = vpack.c.bf16 %v1672_v34, %v1660_v37  ;;  %v1238_v30 = vpack.c.bf16 %v1713_v2, %v1681_v41 }
  0x42   :  { %1223 = vmatpush3.bf16.msra.mxu0 %v1222_v12 }
  0x43   :  { %1247 = vmatpush3.bf16.msra.mxu1 %v1433_v27  ;;  %1225 = vmatprep.subr.bf16.mxu0 %v1224_v10 }
  0x44   :  { %1249 = vmatprep.subr.bf16.mxu1 %v1450_v39 }
  0x46   :  { %1227 = vmatpush3.bf16.msra.mxu0 %v1226_v44 }
  0x47   :  { %1251 = vmatpush3.bf16.msra.mxu1 %v1461_v45  ;;  %1229 = vmatprep.subr.bf16.mxu0 %v1228_v17 }
  0x48   :  { %1253 = vmatprep.subr.bf16.mxu1 %v1489_v62 }
  0x4a   :  { %1231 = vmatpush3.bf16.msra.mxu0 %v1230_v42 }
  0x4b   :  { %1255 = vmatpush3.bf16.msra.mxu1 %v1514_v16  ;;  %1233 = vmatprep.subr.bf16.mxu0 %v1232_v50 }
  0x4c   :  { %1257 = vmatprep.subr.bf16.mxu1 %v1532_v49 }
  0x4e   :  { %1235 = vmatpush3.bf16.msra.mxu0 %v1234_v60 }
  0x4f   :  { %1259 = vmatpush3.bf16.msra.mxu1 %v1556_v4  ;;  %1237 = vmatprep.subr.bf16.mxu0 %v1236_v5 }
  0x50   :  { %1261 = vmatprep.subr.bf16.mxu1 %v1574_v48 }
  0x52   :  { %1239 = vmatpush3.bf16.msra.mxu0 %v1238_v30 }
  0x53   :  { %1263 = vmatpush3.bf16.msra.mxu1 %v1973_v18  ;;  %1273 = vmatprep.subr.bf16.mxu0 %v1272_v6  ;;  %v1980_v6 = vand.u32 4294901760, %v1591_v56 }
  0x54   :  { %1265 = vmatprep.subr.bf16.mxu1 %v1974_v11 }
  0x55   :  { %533 = vmatmul.mubr.f32.vlgmr.msra.gmra.mrb[2].mxu0 %v1709_v19  ;;  %v1981_v19 = vand.u32 4294901760, %v1600_v0 }
  0x56   :  { %1275 = vmatpush3.bf16.msra.mxu0 %v1274_v52  ;;  %807 = vmatprep.mubr.f32.mxu0 %v1975_v8 }
  0x57   :  { %1267 = vmatpush3.bf16.msra.mxu1 %v1976_v13  ;;  %1277 = vmatprep.subr.bf16.mxu0 %v1276_v33  ;;  %v1979_v33 = vand.u32 4294901760, %v1576_v51  ;;  %v1985_v51 = vand.u32 4294901760, %v1642_v54 }
  0x58   :  { %1269 = vmatprep.subr.bf16.mxu1 %v1977_v1 }
  0x5a   :  { %1279 = vmatpush3.bf16.msra.mxu0 %v1278_v47 }
  0x5b   :  { %1271 = vmatpush3.bf16.msra.mxu1 %v1978_v36  ;;  %1281 = vmatprep.subr.bf16.mxu0 %v1280_v55 }
  0x5c   :  { %1305 = vmatprep.subr.bf16.mxu1 %v1406_v14  ;;  %v1292_v14 = vpack.c.bf16 %v1980_v6, %v1979_v33 }
  0x5e   :  { %641 = vmatmul.mubr.f32.vlgmr.msra.gmra.mrb[2].mxu1 %v160_v35  ;;  %1283 = vmatpush3.bf16.msra.mxu0 %v1282_v9 }
  0x5f   :  { %1307 = vmatpush3.bf16.msra.mxu1 %v1416_v20  ;;  %1285 = vmatprep.subr.bf16.mxu0 %v1284_v59  ;;  %v1982_v20 = vand.u32 4294901760, %v1614_v61  ;;  %v1987_v61 = vand.u32 4294901760, %v1660_v37 }
  0x60   :  { %1309 = vmatprep.subr.bf16.mxu1 %v1420_v22  ;;  %911 = vmatprep.mubr.f32.mxu1 %v1975_v8  ;;  %v1983_v22 = vand.u32 4294901760, %v1618_v7  ;;  %v1989_v7 = vand.u32 4294901760, %v1681_v41 }
  0x61   :  { %v1294_v35 = vpack.c.bf16 %v1982_v20, %v1981_v19 }
  0x62   :  { %1287 = vmatpush3.bf16.msra.mxu0 %v1286_v40 }
  0x63   :  { %1311 = vmatpush3.bf16.msra.mxu1 %v1433_v27  ;;  %1289 = vmatprep.subr.bf16.mxu0 %v1288_v46  ;;  %v1984_v27 = vand.u32 4294901760, %v1633_v29 }
  0x64   :  { %1313 = vmatprep.subr.bf16.mxu1 %v1450_v39  ;;  %v1986_v39 = vand.u32 4294901760, %v1656_v53 }
  0x65   :  { %v1296_v52 = vpack.c.bf16 %v1984_v27, %v1983_v22 }
  0x66   :  { %1291 = vmatpush3.bf16.msra.mxu0 %v1290_v63  ;;  %v1298_v56 = vpack.c.bf16 %v1986_v39, %v1985_v51 }
  0x67   :  { %1315 = vmatpush3.bf16.msra.mxu1 %v1461_v45  ;;  %1293 = vmatprep.subr.bf16.mxu0 %v1292_v14  ;;  %v1988_v45 = vand.u32 4294901760, %v1672_v34 }
  0x68   :  { %1317 = vmatprep.subr.bf16.mxu1 %v1489_v62  ;;  %v1990_v62 = vand.u32 4294901760, %v1713_v2 }
  0x69   :  { %v1300_v0 = vpack.c.bf16 %v1988_v45, %v1987_v61 }
  0x6a   :  { %1295 = vmatpush3.bf16.msra.mxu0 %v1294_v35  ;;  %v1302_v29 = vpack.c.bf16 %v1990_v62, %v1989_v7 }
  0x6b   :  { %1319 = vmatpush3.bf16.msra.mxu1 %v1514_v16  ;;  %1297 = vmatprep.subr.bf16.mxu0 %v1296_v52  ;;  %v933_v16 = vld [vmem:[%s1899_s2] ss:$0 sm:$0xff]  ;;  %s1361_s2 = smov [#allocation2]  }
  0x6c   :  { %1321 = vmatprep.subr.bf16.mxu1 %v1532_v49  ;;  %s925_s26 = sshll.u32 %s1361_s2, 4  ;;  %s926_s26 = int_to_ptr.vmem [resolvable:$true] %s925_s26 }
  0x6d   :  { %s1337_s27 = scalar_lea.vmem %s926_s26, 128  ;;  %p1342_p1 = scmp.lt.s32.totalorder %s926_s26, %s926_s26 }
  0x6e   :  { %1299 = vmatpush3.bf16.msra.mxu0 %v1298_v56  ;;  %p1338_p0 = scmp.ne.s32.totalorder %s926_s26, %s1337_s27  ;;  %p1343_p2 = scmp.lt.s32.totalorder %s1337_s27, %s1337_s27 }
  0x6f   :  { %1323 = vmatpush3.bf16.msra.mxu1 %v1556_v4  ;;  %1301 = vmatprep.subr.bf16.mxu0 %v1300_v0 }
  0x70   :  { %1325 = vmatprep.subr.bf16.mxu1 %v1574_v48  ;;  %p1344_p3 = por %p1343_p2, %p1342_p1 }
  0x72   :  { %1303 = vmatpush3.bf16.msra.mxu0 %v1302_v29  ;;  %p1345_p4 = pnand %p1344_p3, %p1338_p0 }
  0x73   :  { %1327 = vmatpush3.bf16.msra.mxu1 %v1973_v18 }
  0x74   :  { %1329 = vmatprep.subr.bf16.mxu1 %v1974_v11 }
  0x75   :  { %809 = vmatmul.mubr.f32.vlgmr.msra.gmra.mrb[4].mxu0 %v1696_v57 }
  0x77   :  { %1331 = vmatpush3.bf16.msra.mxu1 %v1976_v13 }
  0x78   :  { %1333 = vmatprep.subr.bf16.mxu1 %v1977_v1 }
  0x7b   :  { %1335 = vmatpush3.bf16.msra.mxu1 %v1978_v36 }
  0x7e   :  { %913 = vmatmul.mubr.f32.vlgmr.msra.gmra.mrb[4].mxu1 %v1696_v57 }
 0x108   :  { %v966_v41 = vpop.f32.mrb[0].mxu0 }
 0x109   :  { %v967_v53 = vpop.f32.mrb[1].mxu0 }
 0x10a   :  { %v968_v54 = vadd.f32 %v967_v53, %v966_v41 }
 0x10c   :  { %v165_v49 = vadd.f32 %v968_v54, %v933_v16 }
 0x111   :  { %v1001_v4 = vpop.f32.mrb[0].mxu1 }
 0x112   :  { %v1002_v48 = vpop.f32.mrb[1].mxu1 }
 0x113   :  { %v1003_v37 = vadd.f32 %v1002_v48, %v1001_v4 }
 0x115   :  { %v397_v34 = vadd.f32 %v1003_v37, %v165_v49 }
 0x128   :  { %v1036_v2 = vpop.f32.mrb[2].mxu0 }
 0x129   :  { %v1037_v47 = vpop.f32.mrb[3].mxu0 }
 0x12a   :  { %v1038_v31 = vadd.f32 %v1037_v47, %v1036_v2 }
 0x12c   :  { %v535_v32 = vadd.f32 %v1038_v31, %v397_v34 }
 0x131   :  { %v1071_v55 = vpop.f32.mrb[2].mxu1 }
 0x132   :  { %v1072_v15 = vpop.f32.mrb[3].mxu1 }
 0x133   :  { %v1073_v21 = vadd.f32 %v1072_v15, %v1071_v55 }
 0x135   :  { %v643_v57 = vadd.f32 %v1073_v21, %v535_v32 }
 0x148   :  { %v1106_v9 = vpop.f32.mrb[4].mxu0 }
 0x149   :  { %v1107_v25 = vpop.f32.mrb[5].mxu0 }
 0x14a   :  { %v1108_v26 = vadd.f32 %v1107_v25, %v1106_v9 }
 0x14c   :  { %v811_v59 = vadd.f32 %v1108_v26, %v643_v57 }
 0x151   :  { %v1141_v28 = vpop.f32.mrb[4].mxu1 }
 0x152   :  { %v1142_v38 = vpop.f32.mrb[5].mxu1 }
 0x153   :  { %v1143_v40 = vadd.f32 %v1142_v38, %v1141_v28 }
 0x155   :  { %v915_v43 = vadd.f32 %v1143_v40, %v811_v59 }
 0x157   :  { %918 = vst [vmem:[#allocation2] sm:$0xff] %v915_v43 }
 0x158   :  { %1348 = shalt.err (!%p1345_p4)
}
 0x159   :  { %s1349_s30 = scalar_lea.hbm %s1900_s3, 128 }
 0x15a   :  { %p1350_p5 = scmp.ne.s32.totalorder %s1900_s3, %s1349_s30  ;;  %p1353_p6 = scmp.lt.u32.totalorder %s1349_s30, %s1900_s3 }
 0x15c   :  { %p1355_p7 = pnand %p1353_p6, %p1350_p5 }
 0x15e   :  { %1358 = shalt.err (!%p1355_p7)
}
 0x15f   :  { %928 = dma.vmem_to_hbm [thread:$0]  %s926_s26, 128, %s1900_s3, [#allocation3]  }
 0x160   :  { %1359 = dma.done.wait [#allocation3], 128  }
 0x161   :  { %1360 = vsyncadd [#allocation3], 4294967168 }
 0x162   :  { %932 = vsyncpa [#allocation3], 1 }

</bundles_post_ra>
